<compile_context>
chip_gen: v7x
topology: tpu7x:2x2x1
jax: 0.10.0
libtpu: 0.0.40
codegen_flags: <defaults>
</compile_context>

<pallas_src>
import functools
import math

import jax
import jax.numpy as jnp
from jax.experimental import pallas as pl
from jax.experimental.pallas import tpu as pltpu


def _scale_kernel(w_ref, o_ref, *, coef):
    # w_ref / o_ref: (tile_rows, lane_w) tiles in VMEM.
    # Upcast -> scale -> downcast; the VPU work is free (kernel is DMA-bound).
    o_ref[...] = (w_ref[...].astype(jnp.float32) * coef).astype(o_ref.dtype)


_LANE_WIDTHS = (4096, 2048, 1024, 512, 256, 128)   # lane-dense candidate widths
_TARGET_TILE_BYTES = 2 * 1024 * 1024               # ~2 MiB per buffer


def lipschitz_coef_multiplication(weight: jnp.ndarray, coef: float) -> jnp.ndarray:
    """Returns coef * weight, computed in a Pallas TPU kernel."""
    orig_shape = weight.shape
    orig_dtype = weight.dtype
    n = math.prod(orig_shape) if orig_shape else 1
    if n == 0:
        return weight

    flat = weight.reshape(-1)

    # Pick the widest lane width that divides N exactly -> zero-copy view.
    lane_w = next((c for c in _LANE_WIDTHS if n % c == 0), None)
    padded = False
    if lane_w is None:
        # Pad only the tail, once.
        lane_w = 128 if n < 1024 else 1024
        n_total = pl.cdiv(n, lane_w) * lane_w
        flat = jnp.pad(flat, (0, n_total - n))
        padded = True
    else:
        n_total = n

    rows = n_total // lane_w
    w2d = flat.reshape(rows, lane_w)

    # Row-tile sizing: ~2 MiB per buffer, multiple of 8 sublanes, or the full
    # row extent for small weights (full-extent block is always legal).
    elem_bytes = jnp.dtype(orig_dtype).itemsize
    rows_target = max(8, (_TARGET_TILE_BYTES // (lane_w * elem_bytes)) // 8 * 8)
    if rows_target >= rows:
        tile_rows = rows
        grid_rows = 1
    else:
        tile_rows = rows_target                    # multiple of 8
        grid_rows = pl.cdiv(rows, tile_rows)       # ragged last block is masked

    out2d = pl.pallas_call(
        functools.partial(_scale_kernel, coef=float(coef)),
        out_shape=jax.ShapeDtypeStruct((rows, lane_w), orig_dtype),
        grid=(grid_rows,),
        in_specs=[pl.BlockSpec((tile_rows, lane_w), lambda i: (i, 0))],
        out_specs=pl.BlockSpec((tile_rows, lane_w), lambda i: (i, 0)),
        compiler_params=pltpu.CompilerParams(
            dimension_semantics=("parallel",),     # shards across TCs on v7x
        ),
    )(w2d)

    out_flat = out2d.reshape(-1)
    if padded:
        out_flat = out_flat[:n]
    return out_flat.reshape(orig_shape)


if __name__ == "__main__":
    key = jax.random.PRNGKey(0)
    coef = 0.7071067811865476  # e.g. 1/sqrt(2) Lipschitz correction factor

    k1, k2, k3, k4 = jax.random.split(key, 4)
    test_weights = [
        # Small conv-style weight (OIHW) — exercises the tail-pad path.
        jax.random.normal(k1, (4, 4, 3, 3), dtype=jnp.float32),
        # Linear weight — exact lane-dense view, no padding, single block.
        jax.random.normal(k2, (32, 128), dtype=jnp.float32),
        # Larger weight — multi-block parallel grid.
        jax.random.normal(k3, (1024, 1024), dtype=jnp.float32),
        # Rows not a multiple of the tile — exercises the ragged last block.
        jax.random.normal(k4, (520, 1024), dtype=jnp.float32),
    ]

    for w in test_weights:
        result = jax.block_until_ready(lipschitz_coef_multiplication(w, coef))
        expected = coef * w
        assert result.shape == w.shape
        assert result.dtype == w.dtype
        assert jnp.allclose(result, expected, atol=1e-6, rtol=1e-6)

    print("KERNEL_OK")
</pallas_src>

<mosaic_0001>
module attributes {stable_mosaic.version = 11 : i64} {
  func.func @_scale_kernel(%arg0: i32, %arg1: memref<2x128xf32, #tpu.memory_space<vmem>>, %arg2: memref<2x128xf32, #tpu.memory_space<vmem>>) attributes {dimension_semantics = [#tpu.dimension_semantics<parallel>], iteration_bounds = array<i64: 1>, scalar_prefetch = 0 : i64, scratch_operands = 0 : i64, tpu.core_type = #tpu.core_type<tc>, window_params = [{transform_indices = @transform_0, window_bounds = array<i64: 2, 128>}, {transform_indices = @transform_1, window_bounds = array<i64: 2, 128>}]} {
    %c0 = arith.constant 0 : index
    %c0_0 = arith.constant 0 : index
    %0 = vector.load %arg1[%c0, %c0_0] : memref<2x128xf32, #tpu.memory_space<vmem>>, vector<2x128xf32>
    %cst = arith.constant 0.707106769 : f32
    %1 = vector.broadcast %cst : f32 to vector<2x128xf32>
    %2 = arith.mulf %0, %1 : vector<2x128xf32>
    %c0_1 = arith.constant 0 : index
    %c0_2 = arith.constant 0 : index
    %3 = vector.load %arg2[%c0_1, %c0_2] : memref<2x128xf32, #tpu.memory_space<vmem>>, vector<2x128xf32>
    tpu.vector_store %arg2[%c0_1, %c0_2], %2 {strides = array<i32>} : memref<2x128xf32, #tpu.memory_space<vmem>>, vector<2x128xf32>,
    return
  }
  func.func @transform_0(%arg0: i32) -> (i32, i32) {
    %c0_i32 = arith.constant 0 : i32
    %c0_i32_0 = arith.constant 0 : i32
    return %arg0, %c0_i32 : i32, i32
  }
  func.func @transform_1(%arg0: i32) -> (i32, i32) {
    %c0_i32 = arith.constant 0 : i32
    %c0_i32_0 = arith.constant 0 : i32
    return %arg0, %c0_i32 : i32, i32
  }
}

</mosaic_0001>

<bundles_post_ra>
// kernel: tpu_custom_call.1
= control target key start
LH: loop header
LB: loop body
LE: loop exit
PB: predicated region body
PF: predicated region fallthrough
CT: control target
= control target key end

     0   :  { %6 = vsyncpa [#allocation3], 0  ;;  %s125_s0 = inlined_call_operand.hbm [shape: f32[2,128], index: 0, kind: input, shape index: {}]   ;;  %s126_s1 = inlined_call_operand.hbm [shape: f32[2,128], index: 1, kind: output, shape index: {}]  }
   0x1   :  { %7 = vsyncpa [#allocation4], 0  ;;  %s89_s6 = smov [#allocation2]   ;;  %s41_s10 = scalar_lea.hbm %s125_s0, 32 }
   0x2   :  { %s14_s7 = sshll.u32 %s89_s6, 4  ;;  %p42_p0 = scmp.ne.s32.totalorder %s125_s0, %s41_s10  ;;  %s15_s7 = int_to_ptr.vmem [resolvable:$true] %s14_s7 }
   0x3   :  { %p45_p1 = scmp.lt.u32.totalorder %s41_s10, %s125_s0 }
   0x5   :  { %p47_p2 = pnand %p45_p1, %p42_p0 }
   0x7   :  { %50 = shalt.err (!%p47_p2)
}
   0x8   :  { %s51_s15 = scalar_lea.vmem %s15_s7, 32  ;;  %p56_p4 = scmp.lt.s32.totalorder %s15_s7, %s15_s7 }
   0x9   :  { %p52_p3 = scmp.ne.s32.totalorder %s15_s7, %s51_s15  ;;  %p57_p5 = scmp.lt.s32.totalorder %s51_s15, %s51_s15 }
   0xb   :  { %p58_p6 = por %p57_p5, %p56_p4 }
   0xd   :  { %p59_p7 = pnand %p58_p6, %p52_p3 }
   0xf   :  { %62 = shalt.err (!%p59_p7)
}
  0x10   :  { %17 = dma.hbm_to_vmem [thread:$0]  %s125_s0, 32, %s15_s7, [#allocation3]  }
  0x11   :  { %85 = dma.done.wait [#allocation3], 32  }
  0x12   :  { %86 = vsyncadd [#allocation3], 4294967264  ;;  %s90_s18 = smov [#allocation5]   ;;  %v21_v0 = vld [vmem:[#allocation2] sm:$0x3] }
  0x13   :  { %s30_s19 = sshll.u32 %s90_s18, 4  ;;  %v22_v1 = vmul.f32 0.70710677, %v21_v0  ;;  %s31_s19 = int_to_ptr.vmem [resolvable:$true] %s30_s19 }
  0x14   :  { %s63_s20 = scalar_lea.vmem %s31_s19, 32  ;;  %p68_p9 = scmp.lt.s32.totalorder %s31_s19, %s31_s19 }
  0x15   :  { %23 = vst [vmem:[#allocation5] sm:$0x3] %v22_v1  ;;  %p64_p8 = scmp.ne.s32.totalorder %s31_s19, %s63_s20  ;;  %p69_p10 = scmp.lt.s32.totalorder %s63_s20, %s63_s20 }
  0x17   :  { %p70_p11 = por %p69_p10, %p68_p9 }
  0x19   :  { %p71_p12 = pnand %p70_p11, %p64_p8 }
  0x1b   :  { %74 = shalt.err (!%p71_p12)
}
  0x1c   :  { %s75_s23 = scalar_lea.hbm %s126_s1, 32 }
  0x1d   :  { %p76_p13 = scmp.ne.s32.totalorder %s126_s1, %s75_s23  ;;  %p79_p0 = scmp.lt.u32.totalorder %s75_s23, %s126_s1 }
  0x1f   :  { %p81_p1 = pnand %p79_p0, %p76_p13 }
  0x21   :  { %84 = shalt.err (!%p81_p1)
}
  0x22   :  { %33 = dma.vmem_to_hbm [thread:$0]  %s31_s19, 32, %s126_s1, [#allocation4]  }
  0x23   :  { %87 = dma.done.wait [#allocation4], 32  }
  0x24   :  { %88 = vsyncadd [#allocation4], 4294967264 }
  0x25   :  { %37 = vsyncpa [#allocation3], 1 }
  0x26   :  { %38 = vsyncpa [#allocation4], 1 }

</bundles_post_ra>
